<compile_context>
chip_gen: v7x
topology: tpu7x:2x2x1
jax: 0.10.0
libtpu: 0.0.40
codegen_flags: <defaults>
</compile_context>

<pallas_src>
import math
import jax
import jax.numpy as jnp
from jax.experimental import pallas as pl
from jax.experimental.pallas import tpu as pltpu


def _round_up(x, m):
    return ((x + m - 1) // m) * m


def _pick_tile(total, cap):
    """Largest multiple-of-128 divisor of `total` (itself a multiple of 128)
    that does not exceed `cap`."""
    t = min(cap, total)
    while total % t:
        t -= 128
    return t


def _vmem_limit_bytes():
    # Raise the scoped-VMEM budget towards physical capacity (128 MiB on
    # v5e/v6e -> ~96 MiB; 64 MiB on v7x -> ~48 MiB); conservative fallback.
    try:
        cap = pltpu.get_tpu_info().vmem_capacity_bytes
        return int(min(cap * 3 // 4, 96 * 1024 * 1024))
    except Exception:
        return 48 * 1024 * 1024


# --------------------------- Pallas kernel 1 --------------------------------
# h = ReLU( (v / (||v|| + eps)) @ W1_v + (q_mean @ W1_q + b1) )
# Grid: (M tiles [parallel], V tiles [arbitrary / reduction]).

def _lin1_kernel(v_ref, w1v_ref, qc_ref, h_ref, acc_ref, nsq_ref):
    k = pl.program_id(1)

    @pl.when(k == 0)
    def _():
        acc_ref[...] = jnp.zeros_like(acc_ref)
        nsq_ref[...] = jnp.zeros_like(nsq_ref)

    v_blk = v_ref[...]                                       # (B, tk) bf16
    v_f32 = v_blk.astype(jnp.float32)
    # Sum of squares for the deferred L2-norm scale (f32, on the VPU while the
    # MXU runs the matmul).
    nsq_ref[...] += jnp.sum(v_f32 * v_f32, axis=1, keepdims=True)
    # Un-normalized partial matmul on the MXU (bf16 operands, f32 accumulate).
    acc_ref[...] += jnp.dot(v_blk, w1v_ref[...],
                            preferred_element_type=jnp.float32)

    @pl.when(k == pl.num_programs(1) - 1)
    def _():
        # The per-row scale commutes with the linear map: apply it post-matmul.
        inv = pl.reciprocal(jnp.sqrt(nsq_ref[...]) + 1e-8, approx=True)  # (B,1)
        h = acc_ref[...] * inv + qc_ref[...]                             # (B,tm)
        h_ref[...] = jnp.maximum(h, 0.0)


# --------------------------- Pallas kernel 2 --------------------------------
# out = h @ W2 + b2
# Grid: (A tiles [parallel], M tiles [arbitrary / reduction]).

def _lin2_kernel(h_ref, w2_ref, b2_ref, out_ref, acc_ref):
    k = pl.program_id(1)

    @pl.when(k == 0)
    def _():
        acc_ref[...] = jnp.zeros_like(acc_ref)

    acc_ref[...] += jnp.dot(h_ref[...].astype(jnp.bfloat16), w2_ref[...],
                            preferred_element_type=jnp.float32)

    @pl.when(k == pl.num_programs(1) - 1)
    def _():
        out_ref[...] = acc_ref[...] + b2_ref[...]


# ------------------------------ wrapper --------------------------------------

def net_forward(v, q, q_len, params, *, block_k=1024, block_m=512,
                block_a=512, block_km=512):
    """v: (B, C, H, W) f32 NCHW; q: (B, S) int32 token ids; q_len unused
    (matches the reference TextProcessor which ignores q_len)."""
    del q_len
    B = v.shape[0]
    v_flat = v.reshape(B, -1).astype(jnp.float32)             # (B, V)
    V = v_flat.shape[1]

    emb = params["embedding"]                                 # (TOKENS, E)
    w1_v, w1_q = params["w1_v"], params["w1_q"]               # (V, M), (E, M)
    b1 = params["b1"]                                         # (1, M)
    w2, b2 = params["w2"], params["b2"]                       # (M, A), (1, A)
    M, A = w2.shape

    # Lane/sublane-dense padding.
    B_pad = _round_up(B, 8)
    M_pad = _round_up(M, 128)
    A_pad = _round_up(A, 128)
    V_pad = _round_up(V, block_k)

    tm = _pick_tile(M_pad, block_m)
    ta = _pick_tile(A_pad, block_a)
    tkm = _pick_tile(M_pad, block_km)
    n_m, n_k = M_pad // tm, V_pad // block_k
    n_a, n_km = A_pad // ta, M_pad // tkm

    # Vision features streamed in bf16; zero padding is norm/matmul neutral.
    v_p = jnp.pad(v_flat, ((0, B_pad - B), (0, V_pad - V))).astype(jnp.bfloat16)
    w1v_p = jnp.pad(w1_v, ((0, V_pad - V), (0, M_pad - M))).astype(jnp.bfloat16)

    # Question path: E-wide gather + mean over S, tiny f32 matmul, b1 folded.
    # TODO(synk): the data-dependent embedding row gather stays in XLA glue.
    q_mean = jnp.mean(jnp.take(emb, q, axis=0), axis=1)       # (B, E) f32
    q_contrib = jnp.dot(q_mean, w1_q) + b1                    # (B, M) f32
    qc_p = jnp.pad(q_contrib, ((0, B_pad - B), (0, M_pad - M)))

    w2_p = jnp.pad(w2, ((0, M_pad - M), (0, A_pad - A))).astype(jnp.bfloat16)
    b2_p = jnp.pad(b2, ((0, 0), (0, A_pad - A)))

    vmem_limit = _vmem_limit_bytes()

    cost1 = pl.CostEstimate(
        flops=int(2 * B_pad * V_pad * M_pad),
        transcendentals=int(B_pad * n_m),
        bytes_accessed=int(v_p.size * 2 * n_m + w1v_p.size * 2
                           + qc_p.size * 4 + B_pad * M_pad * 4),
    )

    # ---- kernel 1: L2-normalized vision matmul + q contribution + ReLU ----
    h = pl.pallas_call(
        _lin1_kernel,
        out_shape=jax.ShapeDtypeStruct((B_pad, M_pad), jnp.float32),
        grid=(n_m, n_k),
        in_specs=[
            pl.BlockSpec((B_pad, block_k), lambda m, k: (0, k)),   # v tile (bf16)
            pl.BlockSpec((block_k, tm), lambda m, k: (k, m)),      # W1_v tile (bf16)
            pl.BlockSpec((B_pad, tm), lambda m, k: (0, m)),        # q_contrib (+b1)
        ],
        out_specs=pl.BlockSpec((B_pad, tm), lambda m, k: (0, m)),
        scratch_shapes=[
            pltpu.VMEM((B_pad, tm), jnp.float32),   # matmul accumulator
            pltpu.VMEM((B_pad, 1), jnp.float32),    # sum-of-squares accumulator
        ],
        compiler_params=pltpu.CompilerParams(
            dimension_semantics=("parallel", "arbitrary"),
            vmem_limit_bytes=vmem_limit),
        cost_estimate=cost1,
    )(v_p, w1v_p, qc_p)

    # ---- kernel 2: classifier head (h @ W2 + b2), W2 streamed here only ----
    out = pl.pallas_call(
        _lin2_kernel,
        out_shape=jax.ShapeDtypeStruct((B_pad, A_pad), jnp.float32),
        grid=(n_a, n_km),
        in_specs=[
            pl.BlockSpec((B_pad, tkm), lambda a, k: (0, k)),       # h tile
            pl.BlockSpec((tkm, ta), lambda a, k: (k, a)),          # W2 tile (bf16)
            pl.BlockSpec((1, ta), lambda a, k: (0, a)),            # b2
        ],
        out_specs=pl.BlockSpec((B_pad, ta), lambda a, k: (0, a)),
        scratch_shapes=[pltpu.VMEM((B_pad, ta), jnp.float32)],
        compiler_params=pltpu.CompilerParams(
            dimension_semantics=("parallel", "arbitrary"),
            vmem_limit_bytes=vmem_limit),
    )(h, w2_p, b2_p)

    return out[:B, :A]


# --------------------------- parameter setup -------------------------------

def _xavier_uniform(key, fan_in, fan_out, shape):
    bound = math.sqrt(6.0 / (fan_in + fan_out))
    return jax.random.uniform(key, shape, jnp.float32, -bound, bound)


def init_params(key, *, embedding_tokens, embedding_features,
                vision_features, mid_features, max_answers):
    k_emb, k_w1, k_w2 = jax.random.split(key, 3)
    in_features = vision_features + embedding_features

    # Embedding with xavier_uniform init (use_pretrained_glove=False path).
    emb = _xavier_uniform(k_emb, embedding_tokens, embedding_features,
                          (embedding_tokens, embedding_features))

    # lin1: torch weight is (mid, in); stored here as (in, mid). Same xavier bound.
    w1 = _xavier_uniform(k_w1, in_features, mid_features,
                         (in_features, mid_features))
    w1_v = w1[:vision_features, :]
    w1_q = w1[vision_features:, :]
    b1 = jnp.zeros((1, mid_features), jnp.float32)

    # lin2
    w2 = _xavier_uniform(k_w2, mid_features, max_answers,
                         (mid_features, max_answers))
    b2 = jnp.zeros((1, max_answers), jnp.float32)

    return {"embedding": emb, "w1_v": w1_v, "w1_q": w1_q, "b1": b1,
            "w2": w2, "b2": b2}


# -------------------------------- main --------------------------------------

if __name__ == "__main__":
    # Small synthetic config (shapes consistent with the module).
    B = 2                 # batch
    C = 4                 # config.output_features
    HW = 16               # config.output_size -> vision_features = 4*16*16 = 1024
    E = 32                # config.embedding_features
    M = 128               # config.mid_features (lane-dense)
    A = 16                # config.max_answers (padded to 128 inside the kernel)
    S = 8                 # question sequence length
    TOKENS = 50           # embedding_tokens

    V = C * HW * HW

    key = jax.random.PRNGKey(0)
    k_params, k_v, k_q, k_len = jax.random.split(key, 4)

    params = init_params(k_params, embedding_tokens=TOKENS,
                         embedding_features=E, vision_features=V,
                         mid_features=M, max_answers=A)

    v = jax.random.normal(k_v, (B, C, HW, HW), jnp.float32)      # NCHW
    q = jax.random.randint(k_q, (B, S), 0, TOKENS, jnp.int32)
    q_len = jax.random.randint(k_len, (B,), 1, S + 1, jnp.int32)

    out = net_forward(v, q, q_len, params)
    out = jax.block_until_ready(out)

    # Pure-JAX f32 reference of the original forward semantics.
    v_flat = v.reshape(B, -1)
    v_n = v_flat / (jnp.linalg.norm(v_flat, axis=1, keepdims=True) + 1e-8)
    q_mean = jnp.mean(jnp.take(params["embedding"], q, axis=0), axis=1)
    comb = jnp.concatenate([v_n, q_mean], axis=1)
    h = jnp.maximum(
        comb @ jnp.concatenate([params["w1_v"], params["w1_q"]], axis=0)
        + params["b1"], 0.0)
    ref = h @ params["w2"] + params["b2"]

    assert out.shape == (B, A)
    assert bool(jnp.all(jnp.isfinite(out)))
    # Kernel runs the matmuls in bf16 (f32 accumulation) and streams v in bf16;
    # tolerance reflects bf16 operand quantization vs the f32 reference.
    assert jnp.allclose(out, ref, atol=2e-2, rtol=2e-2), (
        f"max abs diff = {float(jnp.max(jnp.abs(out - ref)))}")

    print("KERNEL_OK")
</pallas_src>

<mosaic_0001>
module attributes {stable_mosaic.version = 11 : i64} {
  func.func @_lin1_kernel(%arg0: i32, %arg1: i32, %arg2: memref<8x1024xbf16, #tpu.memory_space<vmem>>, %arg3: memref<1024x128xbf16, #tpu.memory_space<vmem>>, %arg4: memref<8x128xf32, #tpu.memory_space<vmem>>, %arg5: memref<8x128xf32, #tpu.memory_space<vmem>>, %arg6: memref<8x128xf32, #tpu.memory_space<vmem>>, %arg7: memref<8x1xf32, #tpu.memory_space<vmem>>) attributes {dimension_semantics = [#tpu.dimension_semantics<parallel>, #tpu.dimension_semantics<arbitrary>], iteration_bounds = array<i64: 1, 1>, scalar_prefetch = 0 : i64, scratch_operands = 2 : i64, tpu.core_type = #tpu.core_type<tc>, window_params = [{transform_indices = @transform_0, window_bounds = array<i64: 8, 1024>}, {transform_indices = @transform_1, window_bounds = array<i64: 1024, 128>}, {transform_indices = @transform_2, window_bounds = array<i64: 8, 128>}, {transform_indices = @transform_3, window_bounds = array<i64: 8, 128>}]} {
    %c0_i32 = arith.constant 0 : i32
    %0 = arith.cmpi eq, %arg1, %c0_i32 : i32
    %1 = arith.extui %0 : i1 to i32
    %c0_i32_0 = arith.constant 0 : i32
    %2 = arith.cmpi ne, %1, %c0_i32_0 : i32
    scf.if %2 {
      %cst_15 = arith.constant 0.000000e+00 : f32
      %19 = vector.broadcast %cst_15 : f32 to vector<8x128xf32>
      %c0_16 = arith.constant 0 : index
      %c0_17 = arith.constant 0 : index
      %20 = vector.load %arg6[%c0_16, %c0_17] : memref<8x128xf32, #tpu.memory_space<vmem>>, vector<8x128xf32>
      tpu.vector_store %arg6[%c0_16, %c0_17], %19 {strides = array<i32>} : memref<8x128xf32, #tpu.memory_space<vmem>>, vector<8x128xf32>,
      %cst_18 = arith.constant 0.000000e+00 : f32
      %21 = vector.broadcast %cst_18 : f32 to vector<8x1xf32>
      %c0_19 = arith.constant 0 : index
      %c0_20 = arith.constant 0 : index
      %22 = vector.load %arg7[%c0_19, %c0_20] : memref<8x1xf32, #tpu.memory_space<vmem>>, vector<8x1xf32>
      tpu.vector_store %arg7[%c0_19, %c0_20], %21 {strides = array<i32>} : memref<8x1xf32, #tpu.memory_space<vmem>>, vector<8x1xf32>,
    } else {
    }
    %c0 = arith.constant 0 : index
    %c0_1 = arith.constant 0 : index
    %3 = vector.load %arg2[%c0, %c0_1] : memref<8x1024xbf16, #tpu.memory_space<vmem>>, vector<8x1024xbf16>
    %4 = arith.extf %3 : vector<8x1024xbf16> to vector<8x1024xf32>
    %c0_2 = arith.constant 0 : index
    %c0_3 = arith.constant 0 : index
    %5 = vector.load %arg7[%c0_2, %c0_3] : memref<8x1xf32, #tpu.memory_space<vmem>>, vector<8x1xf32>
    %6 = arith.mulf %4, %4 : vector<8x1024xf32>
    %cst = arith.constant dense<0.000000e+00> : vector<8xf32>
    %7 = vector.multi_reduction <add>, %6, %cst [1] : vector<8x1024xf32> to vector<8xf32>
    %8 = vector.shape_cast %7 : vector<8xf32> to vector<8x1xf32>
    %9 = arith.addf %5, %8 : vector<8x1xf32>
    %c0_4 = arith.constant 0 : index
    %c0_5 = arith.constant 0 : index
    %10 = vector.load %arg7[%c0_4, %c0_5] : memref<8x1xf32, #tpu.memory_space<vmem>>, vector<8x1xf32>
    tpu.vector_store %arg7[%c0_4, %c0_5], %9 {strides = array<i32>} : memref<8x1xf32, #tpu.memory_space<vmem>>, vector<8x1xf32>,
    %c0_6 = arith.constant 0 : index
    %c0_7 = arith.constant 0 : index
    %11 = vector.load %arg6[%c0_6, %c0_7] : memref<8x128xf32, #tpu.memory_space<vmem>>, vector<8x128xf32>
    %c0_8 = arith.constant 0 : index
    %c0_9 = arith.constant 0 : index
    %12 = vector.load %arg3[%c0_8, %c0_9] : memref<1024x128xbf16, #tpu.memory_space<vmem>>, vector<1024x128xbf16>
    %cst_10 = arith.constant dense<0.000000e+00> : vector<8x128xf32>
    %13 = tpu.matmul %3, %12, %cst_10 {dimension_numbers = #tpu.dot_dimension_numbers<[1], [0], [0], [1], [0, 0, 1, 1], [], []>} : vector<8x1024xbf16>, vector<1024x128xbf16>, vector<8x128xf32> -> vector<8x128xf32>
    %14 = arith.addf %11, %13 : vector<8x128xf32>
    %c0_11 = arith.constant 0 : index
    %c0_12 = arith.constant 0 : index
    %15 = vector.load %arg6[%c0_11, %c0_12] : memref<8x128xf32, #tpu.memory_space<vmem>>, vector<8x128xf32>
    tpu.vector_store %arg6[%c0_11, %c0_12], %14 {strides = array<i32>} : memref<8x128xf32, #tpu.memory_space<vmem>>, vector<8x128xf32>,
    %c0_i32_13 = arith.constant 0 : i32
    %16 = arith.cmpi eq, %arg1, %c0_i32_13 : i32
    %17 = arith.extui %16 : i1 to i32
    %c0_i32_14 = arith.constant 0 : i32
    %18 = arith.cmpi ne, %17, %c0_i32_14 : i32
    scf.if %18 {
      %c0_15 = arith.constant 0 : index
      %c0_16 = arith.constant 0 : index
      %19 = vector.load %arg7[%c0_15, %c0_16] : memref<8x1xf32, #tpu.memory_space<vmem>>, vector<8x1xf32>
      %20 = math.sqrt %19 : vector<8x1xf32>
      %cst_17 = arith.constant 9.99999993E-9 : f32
      %21 = vector.broadcast %cst_17 : f32 to vector<8x1xf32>
      %22 = arith.addf %20, %21 : vector<8x1xf32>
      %23 = tpu.reciprocal %22 {approx = true} : vector<8x1xf32> -> vector<8x1xf32>
      %c0_18 = arith.constant 0 : index
      %c0_19 = arith.constant 0 : index
      %24 = vector.load %arg6[%c0_18, %c0_19] : memref<8x128xf32, #tpu.memory_space<vmem>>, vector<8x128xf32>
      %25 = vector.broadcast %23 : vector<8x1xf32> to vector<8x128xf32>
      %26 = arith.mulf %24, %25 : vector<8x128xf32>
      %c0_20 = arith.constant 0 : index
      %c0_21 = arith.constant 0 : index
      %27 = vector.load %arg4[%c0_20, %c0_21] : memref<8x128xf32, #tpu.memory_space<vmem>>, vector<8x128xf32>
      %28 = arith.addf %26, %27 : vector<8x128xf32>
      %cst_22 = arith.constant 0.000000e+00 : f32
      %29 = vector.broadcast %cst_22 : f32 to vector<8x128xf32>
      %30 = arith.maximumf %28, %29 : vector<8x128xf32>
      %c0_23 = arith.constant 0 : index
      %c0_24 = arith.constant 0 : index
      %31 = vector.load %arg5[%c0_23, %c0_24] : memref<8x128xf32, #tpu.memory_space<vmem>>, vector<8x128xf32>
      tpu.vector_store %arg5[%c0_23, %c0_24], %30 {strides = array<i32>} : memref<8x128xf32, #tpu.memory_space<vmem>>, vector<8x128xf32>,
    } else {
    }
    return
  }
  func.func @transform_0(%arg0: i32, %arg1: i32) -> (i32, i32) {
    %c0_i32 = arith.constant 0 : i32
    %c0_i32_0 = arith.constant 0 : i32
    return %c0_i32, %arg1 : i32, i32
  }
  func.func @transform_1(%arg0: i32, %arg1: i32) -> (i32, i32) {
    %c0_i32 = arith.constant 0 : i32
    return %arg1, %arg0 : i32, i32
  }
  func.func @transform_2(%arg0: i32, %arg1: i32) -> (i32, i32) {
    %c0_i32 = arith.constant 0 : i32
    %c0_i32_0 = arith.constant 0 : i32
    return %c0_i32, %arg0 : i32, i32
  }
  func.func @transform_3(%arg0: i32, %arg1: i32) -> (i32, i32) {
    %c0_i32 = arith.constant 0 : i32
    %c0_i32_0 = arith.constant 0 : i32
    return %c0_i32, %arg0 : i32, i32
  }
}

</mosaic_0001>

<bundles_post_ra>
// kernel: tpu_custom_call.1
= control target key start
LH: loop header
LB: loop body
LE: loop exit
PB: predicated region body
PF: predicated region fallthrough
CT: control target
= control target key end

     0   :  { %8 = vsyncpa [#allocation5], 0  ;;  %s1285_s0 = inlined_call_operand.hbm [shape: bf16[8,1024], index: 0, kind: input, shape index: {}]   ;;  %s1286_s1 = inlined_call_operand.hbm [shape: bf16[1024,128], index: 1, kind: input, shape index: {}]   ;;  %s1287_s2 = inlined_call_operand.hbm [shape: f32[8,128], index: 2, kind: input, shape index: {}]   ;;  %s1288_s3 = inlined_call_operand.hbm [shape: f32[8,128], index: 3, kind: output, shape index: {}]  }
   0x1   :  { %9 = vsyncpa [#allocation8], 0 }
   0x2   :  { %10 = vsyncpa [#allocation6], 0  ;;  %s1175_s12 = smov [#allocation7]   ;;  %s1081_s16 = scalar_lea.hbm %s1286_s1, 8192 }
   0x3   :  { %s26_s13 = sshll.u32 %s1175_s12, 4  ;;  %p1082_p0 = scmp.ne.s32.totalorder %s1286_s1, %s1081_s16  ;;  %s27_s13 = int_to_ptr.vmem [resolvable:$true] %s26_s13 }
   0x4   :  { %p1085_p1 = scmp.lt.u32.totalorder %s1081_s16, %s1286_s1 }
   0x6   :  { %p1087_p2 = pnand %p1085_p1, %p1082_p0 }
   0x8   :  { %1090 = shalt.err (!%p1087_p2)
}
   0x9   :  { %s1091_s21 = scalar_lea.vmem %s27_s13, 8192  ;;  %p1096_p4 = scmp.lt.s32.totalorder %s27_s13, %s27_s13 }
   0xa   :  { %p1092_p3 = scmp.ne.s32.totalorder %s27_s13, %s1091_s21  ;;  %p1097_p5 = scmp.lt.s32.totalorder %s1091_s21, %s1091_s21 }
   0xc   :  { %p1098_p6 = por %p1097_p5, %p1096_p4 }
   0xe   :  { %p1099_p7 = pnand %p1098_p6, %p1092_p3 }
  0x10   :  { %1102 = shalt.err (!%p1099_p7)
}
  0x11   :  { %s1176_s22 = smov 64   ;;  %s1177_s23 = smov 4  }
  0x12   :  { %32 = dma.hbm_to_vmem [thread:$0]  %s1286_s1, 8192, %s27_s13, [#allocation8], %s1176_s22, %s1176_s22, %s1177_s23  }
  0x13   :  { %s1178_s26 = smov [#allocation4]   ;;  %s1179_s28 = smov [#allocation9]  }
  0x14   :  { %s17_s27 = sshll.u32 %s1178_s26, 4  ;;  %s39_s29 = sshll.u32 %s1179_s28, 4  ;;  %s18_s27 = int_to_ptr.vmem [resolvable:$true] %s17_s27  ;;  %s40_s29 = int_to_ptr.vmem [resolvable:$true] %s39_s29 }
  0x15   :  { %s1103_s5 = scalar_lea.hbm %s1285_s0, 512 }
  0x16   :  { %p1104_p8 = scmp.ne.s32.totalorder %s1285_s0, %s1103_s5  ;;  %p1107_p9 = scmp.lt.u32.totalorder %s1103_s5, %s1285_s0 }
  0x18   :  { %p1109_p10 = pnand %p1107_p9, %p1104_p8 }
  0x1a   :  { %1112 = shalt.err (!%p1109_p10)
}
  0x1b   :  { %s1113_s1 = scalar_lea.vmem %s18_s27, 512  ;;  %p1118_p12 = scmp.lt.s32.totalorder %s18_s27, %s18_s27 }
  0x1c   :  { %p1114_p11 = scmp.ne.s32.totalorder %s18_s27, %s1113_s1  ;;  %p1119_p13 = scmp.lt.s32.totalorder %s1113_s1, %s1113_s1 }
  0x1e   :  { %p1120_p0 = por %p1119_p13, %p1118_p12 }
  0x20   :  { %p1121_p1 = pnand %p1120_p0, %p1114_p11 }
  0x22   :  { %1124 = shalt.err (!%p1121_p1)
}
  0x23   :  { %20 = dma.hbm_to_vmem [thread:$0]  %s1285_s0, 512, %s18_s27, [#allocation5]  }
  0x24   :  { %s1125_s14 = scalar_lea.hbm %s1287_s2, 128 }
  0x25   :  { %p1126_p2 = scmp.ne.s32.totalorder %s1287_s2, %s1125_s14  ;;  %p1129_p3 = scmp.lt.u32.totalorder %s1125_s14, %s1287_s2 }
  0x27   :  { %p1131_p4 = pnand %p1129_p3, %p1126_p2 }
  0x29   :  { %1134 = shalt.err (!%p1131_p4)
}
  0x2a   :  { %s1135_s19 = scalar_lea.vmem %s40_s29, 128  ;;  %p1140_p6 = scmp.lt.s32.totalorder %s40_s29, %s40_s29 }
  0x2b   :  { %p1136_p5 = scmp.ne.s32.totalorder %s40_s29, %s1135_s19  ;;  %p1141_p7 = scmp.lt.s32.totalorder %s1135_s19, %s1135_s19 }
  0x2d   :  { %p1142_p8 = por %p1141_p7, %p1140_p6 }
  0x2f   :  { %p1143_p9 = pnand %p1142_p8, %p1136_p5 }
  0x31   :  { %1146 = shalt.err (!%p1143_p9)
}
  0x32   :  { %42 = dma.hbm_to_vmem [thread:$0]  %s1287_s2, 128, %s40_s29, [#allocation8]  }
  0x33   :  { %1169 = dma.done.wait [#allocation5], 512  }
  0x34   :  { %1170 = vsyncadd [#allocation5], 4294966784 }
  0x35   :  { %1171 = dma.done.wait [#allocation8], 8320  }
  0x36   :  { %1172 = vsyncadd [#allocation8], 4294958976  ;;  %vm58_vm0 = vcmask 7168   ;;  %v1180_v0 = vmov 0.0   ;;  %v1005_v1 = vld [vmem:[#allocation7 + $0x40] sm:$0xff]   ;;  %v1009_v5 = vld [vmem:[#allocation7 + $0x48] sm:$0xff]  }
  0x37   :  { %59 = vst.msk [vmem:[#allocation3] sm:$0xff] %vm58_vm0, %v1180_v0  ;;  %v1006_v2 = vld [vmem:[#allocation7] sm:$0xff]   ;;  %908 = vmatprep.subr.bf16.mxu0 %v1005_v1  ;;  %v1010_v6 = vld [vmem:[#allocation7 + $0x8] sm:$0xff]   ;;  %v1244_v9 = vld [vmem:[#allocation4 + $0x10] sm:$0xff]  ;;  %s1182_s2 = smov [#allocation10]  }
  0x38   :  { %v1007_v3 = vld [vmem:[#allocation7 + $0xc0] sm:$0xff]   ;;  %909 = vmatpush3.bf16.msra.mxu0 %v1006_v2  ;;  %v1242_v8 = vld [vmem:[#allocation4 + $0x8] sm:$0xff]  ;;  %v1250_v14 = vld [vmem:[#allocation4 + $0x18] sm:$0xff]  ;;  %v68_v16 = vunpack.c.l.bf16 %v1244_v9  ;;  %v69_v21 = vunpack.c.h.bf16 %v1244_v9  ;;  %v841_v63 = vcombine.high %v1244_v9, %v1244_v9  ;;  %s826_s21 = sshll.u32 %s1182_s2, 4  ;;  %s827_s21 = int_to_ptr.vmem [resolvable:$true] %s826_s21 }
  0x39   :  { %v1008_v4 = vld [vmem:[#allocation7 + $0x80] sm:$0xff]   ;;  %930 = vmatprep.subr.bf16.mxu1 %v1007_v3  ;;  %910 = vmatprep.subr.bf16.mxu0 %v1009_v5  ;;  %v66_v12 = vunpack.c.l.bf16 %v1242_v8  ;;  %v67_v13 = vunpack.c.h.bf16 %v1242_v8  ;;  %v1011_v15 = vld [vmem:[#allocation7 + $0xc8] sm:$0xff]   ;;  %v1013_v22 = vld [vmem:[#allocation7 + $0x50] sm:$0xff]   ;;  %v839_v27 = vcombine.high %v1242_v8, %v1242_v8  ;;  %v70_v29 = vunpack.c.l.bf16 %v1250_v14  ;;  %s1147_s22 = scalar_lea.vmem %s827_s21, 128  ;;  %p1152_p11 = scmp.lt.s32.totalorder %s827_s21, %s827_s21 }
  0x3a   :  { %931 = vmatpush3.bf16.msra.mxu1 %v1008_v4  ;;  %v1240_v7 = vld [vmem:[#allocation4] sm:$0xff]  ;;  %v1012_v20 = vld [vmem:[#allocation7 + $0x88] sm:$0xff]   ;;  %v1014_v25 = vld [vmem:[#allocation7 + $0x10] sm:$0xff]   ;;  %v77_v30 = vmul.f32 %v68_v16, %v68_v16  ;;  %v71_v34 = vunpack.c.h.bf16 %v1250_v14  ;;  %v78_v35 = vmul.f32 %v69_v21, %v69_v21  ;;  %v838_v1 = vcombine.low %v1242_v8, %v1242_v8  ;;  %p1148_p10 = scmp.ne.s32.totalorder %s827_s21, %s1147_s22  ;;  %p1153_p12 = scmp.lt.s32.totalorder %s1147_s22, %s1147_s22 }
  0x3b   :  { %v64_v10 = vunpack.c.l.bf16 %v1240_v7  ;;  %v65_v11 = vunpack.c.h.bf16 %v1240_v7  ;;  %v75_v19 = vmul.f32 %v66_v12, %v66_v12  ;;  %932 = vmatprep.subr.bf16.mxu1 %v1011_v15  ;;  %v76_v23 = vmul.f32 %v67_v13, %v67_v13  ;;  %v1015_v28 = vld [vmem:[#allocation7 + $0xd0] sm:$0xff]   ;;  %v1017_v33 = vld [vmem:[#allocation7 + $0x58] sm:$0xff]   ;;  %706 = vmatprep.mubr.bf16.mxu1 %v839_v27  ;;  %v1021_v42 = vld [vmem:[#allocation7 + $0x60] sm:$0xff]  }
  0x3c   :  { %911 = vmatpush3.bf16.msra.mxu0 %v1010_v6  ;;  %v837_v26 = vcombine.high %v1240_v7, %v1240_v7  ;;  %v1016_v32 = vld [vmem:[#allocation7 + $0x90] sm:$0xff]   ;;  %v1018_v37 = vld [vmem:[#allocation7 + $0x18] sm:$0xff]   ;;  %v79_v39 = vmul.f32 %v70_v29, %v70_v29  ;;  %v80_v43 = vmul.f32 %v71_v34, %v71_v34  ;;  %v1022_v45 = vld [vmem:[#allocation7 + $0x20] sm:$0xff]   ;;  %v836_v61 = vcombine.low %v1240_v7, %v1240_v7  ;;  %p1154_p13 = por %p1153_p12, %p1152_p11 }
  0x3d   :  { %v73_v17 = vmul.f32 %v64_v10, %v64_v10  ;;  %v74_v18 = vmul.f32 %v65_v11, %v65_v11  ;;  %912 = vmatprep.subr.bf16.mxu0 %v1013_v22  ;;  %v1019_v38 = vld [vmem:[#allocation7 + $0xd8] sm:$0xff]   ;;  %v1023_v46 = vld [vmem:[#allocation7 + $0xe0] sm:$0xff]   ;;  %v1025_v49 = vld [vmem:[#allocation7 + $0x68] sm:$0xff]   ;;  %v843_v3 = vcombine.high %v1250_v14, %v1250_v14  ;;  %v1181_v12 = vmov 0  }
  0x3e   :  { %933 = vmatpush3.bf16.msra.mxu1 %v1012_v20  ;;  %666 = vmatprep.mubr.bf16.mxu0 %v837_v26  ;;  %v1020_v41 = vld [vmem:[#allocation7 + $0x98] sm:$0xff]   ;;  %v1024_v48 = vld [vmem:[#allocation7 + $0xa0] sm:$0xff]   ;;  %v1026_v51 = vld [vmem:[#allocation7 + $0x28] sm:$0xff]   ;;  %p1155_p0 = pnand %p1154_p13, %p1148_p10 }
  0x3f   :  { %v81_v24 = vadd.f32 %v74_v18, %v73_v17  ;;  %934 = vmatprep.subr.bf16.mxu1 %v1015_v28  ;;  %v1027_v52 = vld [vmem:[#allocation7 + $0xe8] sm:$0xff]   ;;  %v1029_v54 = vld [vmem:[#allocation7 + $0x70] sm:$0xff]   ;;  %v1033_v58 = vld [vmem:[#allocation7 + $0x78] sm:$0xff]   ;;  %1004 = vset.pattern.permute.xlu0 %v1181_v12 }
  0x40   :  { %913 = vmatpush3.bf16.msra.mxu0 %v1014_v25  ;;  %v1028_v53 = vld [vmem:[#allocation7 + $0xa8] sm:$0xff]   ;;  %v1030_v55 = vld [vmem:[#allocation7 + $0x30] sm:$0xff]   ;;  %v1034_v59 = vld [vmem:[#allocation7 + $0x38] sm:$0xff]  }
  0x41   :  { %v82_v31 = vadd.f32 %v81_v24, %v75_v19  ;;  %914 = vmatprep.subr.bf16.mxu0 %v1017_v33  ;;  %v1031_v56 = vld [vmem:[#allocation7 + $0xf0] sm:$0xff]   ;;  %v1035_v60 = vld [vmem:[#allocation7 + $0xf8] sm:$0xff]   ;;  %v1038_v0 = vld [vmem:[#allocation7 + $0x140] sm:$0xff]  }
  0x42   :  { %935 = vmatpush3.bf16.msra.mxu1 %v1016_v32  ;;  %v1032_v57 = vld [vmem:[#allocation7 + $0xb0] sm:$0xff]   ;;  %v1036_v62 = vld [vmem:[#allocation7 + $0xb8] sm:$0xff]   ;;  %v1040_v2 = vld [vmem:[#allocation7 + $0x100] sm:$0xff]  }
  0x43   :  { %v83_v36 = vadd.f32 %v82_v31, %v76_v23  ;;  %936 = vmatprep.subr.bf16.mxu1 %v1019_v38  ;;  %v1042_v4 = vld [vmem:[#allocation7 + $0x1c0] sm:$0xff]   ;;  %v1045_v6 = vld [vmem:[#allocation7 + $0x148] sm:$0xff]   ;;  %v1049_v11 = vld [vmem:[#allocation7 + $0x150] sm:$0xff]   ;;  %v842_v38 = vcombine.low %v1250_v14, %v1250_v14 }
  0x44   :  { %915 = vmatpush3.bf16.msra.mxu0 %v1018_v37  ;;  %v1044_v5 = vld [vmem:[#allocation7 + $0x180] sm:$0xff]   ;;  %v1046_v7 = vld [vmem:[#allocation7 + $0x108] sm:$0xff]   ;;  %v1050_v13 = vld [vmem:[#allocation7 + $0x110] sm:$0xff]  }
  0x45   :  { %v84_v40 = vadd.f32 %v83_v36, %v77_v30  ;;  %916 = vmatprep.subr.bf16.mxu0 %v1021_v42  ;;  %v1047_v10 = vld [vmem:[#allocation7 + $0x1c8] sm:$0xff]   ;;  %v1051_v15 = vld [vmem:[#allocation7 + $0x1d0] sm:$0xff]   ;;  %v1053_v17 = vld [vmem:[#allocation7 + $0x158] sm:$0xff]   ;;  %v840_v36 = vcombine.low %v1244_v9, %v1244_v9 }
  0x46   :  { %937 = vmatpush3.bf16.msra.mxu1 %v1020_v41  ;;  %v1048_v8 = vld [vmem:[#allocation7 + $0x188] sm:$0xff]   ;;  %v1052_v16 = vld [vmem:[#allocation7 + $0x190] sm:$0xff]   ;;  %v1054_v18 = vld [vmem:[#allocation7 + $0x118] sm:$0xff]  }
  0x47   :  { %v85_v44 = vadd.f32 %v84_v40, %v78_v35  ;;  %938 = vmatprep.subr.bf16.mxu1 %v1023_v46  ;;  %v1055_v19 = vld [vmem:[#allocation7 + $0x1d8] sm:$0xff]   ;;  %v1057_v21 = vld [vmem:[#allocation7 + $0x160] sm:$0xff]   ;;  %v1061_v25 = vld [vmem:[#allocation7 + $0x168] sm:$0xff]  }
  0x48   :  { %917 = vmatpush3.bf16.msra.mxu0 %v1022_v45  ;;  %v1056_v20 = vld [vmem:[#allocation7 + $0x198] sm:$0xff]   ;;  %v1058_v22 = vld [vmem:[#allocation7 + $0x120] sm:$0xff]   ;;  %v1062_v26 = vld [vmem:[#allocation7 + $0x128] sm:$0xff]  }
  0x49   :  { %v86_v47 = vadd.f32 %v85_v44, %v79_v39  ;;  %918 = vmatprep.subr.bf16.mxu0 %v1025_v49  ;;  %v1059_v23 = vld [vmem:[#allocation7 + $0x1e0] sm:$0xff]   ;;  %v1063_v27 = vld [vmem:[#allocation7 + $0x1e8] sm:$0xff]   ;;  %v1065_v29 = vld [vmem:[#allocation7 + $0x170] sm:$0xff]  }
  0x4a   :  { %939 = vmatpush3.bf16.msra.mxu1 %v1024_v48  ;;  %v1060_v24 = vld [vmem:[#allocation7 + $0x1a0] sm:$0xff]   ;;  %v1064_v28 = vld [vmem:[#allocation7 + $0x1a8] sm:$0xff]   ;;  %v1066_v30 = vld [vmem:[#allocation7 + $0x130] sm:$0xff]  }
  0x4b   :  { %v87_v50 = vadd.f32 %v86_v47, %v80_v43  ;;  %940 = vmatprep.subr.bf16.mxu1 %v1027_v52  ;;  %v1067_v31 = vld [vmem:[#allocation7 + $0x1f0] sm:$0xff]   ;;  %v1069_v33 = vld [vmem:[#allocation7 + $0x178] sm:$0xff]  }
  0x4c   :  { %919 = vmatpush3.bf16.msra.mxu0 %v1026_v51  ;;  %v1068_v32 = vld [vmem:[#allocation7 + $0x1b0] sm:$0xff]   ;;  %v1070_v34 = vld [vmem:[#allocation7 + $0x138] sm:$0xff]  }
  0x4d   :  { %88 = vadd.xlane.f32.xlu0 %v87_v50  ;;  %920 = vmatprep.subr.bf16.mxu0 %v1029_v54  ;;  %v1071_v35 = vld [vmem:[#allocation7 + $0x1f8] sm:$0xff]  }
  0x4e   :  { %941 = vmatpush3.bf16.msra.mxu1 %v1028_v53  ;;  %v1073_v37 = vld [vmem:[#allocation7 + $0x1b8] sm:$0xff]  }
  0x4f   :  { %942 = vmatprep.subr.bf16.mxu1 %v1031_v56  ;;  %v72_v39 = vld [vmem:[#allocation3] sm:$0xff] }
  0x50   :  { %921 = vmatpush3.bf16.msra.mxu0 %v1030_v55 }
  0x51   :  { %922 = vmatprep.subr.bf16.mxu0 %v1033_v58 }
  0x52   :  { %943 = vmatpush3.bf16.msra.mxu1 %v1032_v57 }
  0x53   :  { %944 = vmatprep.subr.bf16.mxu1 %v1035_v60 }
  0x54   :  { %923 = vmatpush3.bf16.msra.mxu0 %v1034_v59 }
  0x55   :  { %952 = vmatprep.subr.bf16.mxu0 %v1038_v0 }
  0x56   :  { %945 = vmatpush3.bf16.msra.mxu1 %v1036_v62 }
  0x57   :  { %667 = vmatmul.mubr.bf16.vlgmr.msra.gmra.mrb[0].mxu0 %v836_v61  ;;  %974 = vmatprep.subr.bf16.mxu1 %v1042_v4 }
  0x58   :  { %953 = vmatpush3.bf16.msra.mxu0 %v1040_v2  ;;  %746 = vmatprep.mubr.bf16.mxu0 %v841_v63 }
  0x59   :  { %707 = vmatmul.mubr.bf16.vlgmr.msra.gmra.mrb[0].mxu1 %v838_v1  ;;  %954 = vmatprep.subr.bf16.mxu0 %v1045_v6 }
  0x5a   :  { %975 = vmatpush3.bf16.msra.mxu1 %v1044_v5  ;;  %786 = vmatprep.mubr.bf16.mxu1 %v843_v3 }
  0x5b   :  { %976 = vmatprep.subr.bf16.mxu1 %v1047_v10 }
  0x5c   :  { %955 = vmatpush3.bf16.msra.mxu0 %v1046_v7  ;;  %v816_v7 = vld [vmem:[#allocation9] sm:$0xff] }
  0x5d   :  { %956 = vmatprep.subr.bf16.mxu0 %v1049_v11 }
  0x5e   :  { %977 = vmatpush3.bf16.msra.mxu1 %v1048_v8 }
  0x5f   :  { %978 = vmatprep.subr.bf16.mxu1 %v1051_v15 }
  0x60   :  { %957 = vmatpush3.bf16.msra.mxu0 %v1050_v13 }
  0x61   :  { %958 = vmatprep.subr.bf16.mxu0 %v1053_v17 }
  0x62   :  { %979 = vmatpush3.bf16.msra.mxu1 %v1052_v16 }
  0x63   :  { %980 = vmatprep.subr.bf16.mxu1 %v1055_v19 }
  0x64   :  { %959 = vmatpush3.bf16.msra.mxu0 %v1054_v18 }
  0x65   :  { %960 = vmatprep.subr.bf16.mxu0 %v1057_v21 }
  0x66   :  { %981 = vmatpush3.bf16.msra.mxu1 %v1056_v20 }
  0x67   :  { %982 = vmatprep.subr.bf16.mxu1 %v1059_v23 }
  0x68   :  { %961 = vmatpush3.bf16.msra.mxu0 %v1058_v22 }
  0x69   :  { %962 = vmatprep.subr.bf16.mxu0 %v1061_v25 }
  0x6a   :  { %983 = vmatpush3.bf16.msra.mxu1 %v1060_v24 }
  0x6b   :  { %984 = vmatprep.subr.bf16.mxu1 %v1063_v27 }
  0x6c   :  { %963 = vmatpush3.bf16.msra.mxu0 %v1062_v26 }
  0x6d   :  { %964 = vmatprep.subr.bf16.mxu0 %v1065_v29 }
  0x6e   :  { %985 = vmatpush3.bf16.msra.mxu1 %v1064_v28 }
  0x6f   :  { %986 = vmatprep.subr.bf16.mxu1 %v1067_v31 }
  0x70   :  { %965 = vmatpush3.bf16.msra.mxu0 %v1066_v30 }
  0x71   :  { %966 = vmatprep.subr.bf16.mxu0 %v1069_v33 }
  0x72   :  { %987 = vmatpush3.bf16.msra.mxu1 %v1068_v32 }
  0x73   :  { %988 = vmatprep.subr.bf16.mxu1 %v1071_v35 }
  0x74   :  { %967 = vmatpush3.bf16.msra.mxu0 %v1070_v34 }
  0x76   :  { %989 = vmatpush3.bf16.msra.mxu1 %v1073_v37 }
  0x77   :  { %747 = vmatmul.mubr.bf16.vlgmr.msra.gmra.mrb[4].mxu0 %v840_v36 }
  0x79   :  { %787 = vmatmul.mubr.bf16.vlgmr.msra.gmra.mrb[4].mxu1 %v842_v38 }
  0xda   :  { %v89_v40 = vpop.xlane.xlu0 %88 }
  0xdb   :  { %v90_v41 = vadd.f32 %v89_v40, %v72_v39 }
  0xdd   :  { %92 = vst.msk [vmem:[#allocation3] sm:$0xff] %vm58_vm0, %v90_v41 }
  0xe4   :  { %v799_v42 = vld [vmem:[#allocation3] sm:$0xff] }
  0xe5   :  { %1077 = vrsqrt.f32 %v799_v42  ;;  %vm802_vm1 = vcmp.eq.f32.partialorder %v799_v42, inf  ;;  %v805_v9 = vand.u32 2147483648, %v799_v42  ;;  %vm804_vm2 = vcmp.eq.f32.partialorder %v799_v42, 0.0 }
  0xef   :  { %v1078_v43 = vpop.eup %1077 }
  0xf0   :  { %v801_v44 = vmul.f32 %v1078_v43, %v799_v42 }
  0xf2   :  { %v803_v45 = vsel %vm802_vm1, %v799_v42, %v801_v44 }
  0xf3   :  { %v806_v46 = vsel %vm804_vm2, %v805_v9, %v803_v45 }
  0xf4   :  { %v807_v47 = vadd.f32 1e-08, %v806_v46 }
  0xf6   :  { %1079 = vrcp.f32 %v807_v47 }
 0x100   :  { %v1080_v14 = vpop.eup %1079 }
 0x101   :  { %812 = vperm.xlu0 %1004, %v1080_v14  }
 0x12a   :  { %v924_v48 = vpop.f32.mrb[0].mxu0 }
 0x12b   :  { %v925_v49 = vpop.f32.mrb[1].mxu0 }
 0x12c   :  { %v926_v50 = vadd.f32 %v925_v49, %v924_v48  ;;  %v927_v51 = vpop.f32.mrb[2].mxu0  ;;  %v946_v52 = vpop.f32.mrb[0].mxu1 }
 0x12d   :  { %v928_v53 = vpop.f32.mrb[3].mxu0  ;;  %v947_v54 = vpop.f32.mrb[1].mxu1 }
 0x12e   :  { %v948_v55 = vadd.f32 %v947_v54, %v946_v52  ;;  %v949_v56 = vpop.f32.mrb[2].mxu1 }
 0x12f   :  { %v950_v57 = vpop.f32.mrb[3].mxu1 }
 0x130   :  { %v709_v58 = vadd.f32 %v948_v55, %v926_v50 }
 0x14a   :  { %v968_v59 = vpop.f32.mrb[4].mxu0 }
 0x14b   :  { %v969_v60 = vpop.f32.mrb[5].mxu0 }
 0x14c   :  { %v970_v61 = vadd.f32 %v969_v60, %v968_v59  ;;  %v990_v62 = vpop.f32.mrb[4].mxu1  ;;  %v971_v63 = vpop.f32.mrb[6].mxu0 }
 0x14d   :  { %v991_v0 = vpop.f32.mrb[5].mxu1  ;;  %v972_v1 = vpop.f32.mrb[7].mxu0 }
 0x14e   :  { %v749_v2 = vadd.f32 %v970_v61, %v709_v58  ;;  %v992_v3 = vadd.f32 %v991_v0, %v990_v62  ;;  %v993_v4 = vpop.f32.mrb[6].mxu1 }
 0x14f   :  { %v994_v5 = vpop.f32.mrb[7].mxu1 }
 0x150   :  { %v789_v6 = vadd.f32 %v992_v3, %v749_v2 }
 0x180   :  { %v813_v10 = vpop.permute.xlu0 %812 }
 0x181   :  { %v815_v8 = vmul.f32 %v813_v10, %v789_v6 }
 0x183   :  { %v817_v11 = vadd.f32 %v816_v7, %v815_v8 }
 0x185   :  { %v818_v12 = vmax.f32 %v817_v11, 0.0 }
 0x187   :  { %819 = vst [vmem:[#allocation10] sm:$0xff] %v818_v12 }
 0x188   :  { %1158 = shalt.err (!%p1155_p0)
}
 0x189   :  { %s1159_s25 = scalar_lea.hbm %s1288_s3, 128 }
 0x18a   :  { %p1160_p1 = scmp.ne.s32.totalorder %s1288_s3, %s1159_s25  ;;  %p1163_p2 = scmp.lt.u32.totalorder %s1159_s25, %s1288_s3 }
 0x18c   :  { %p1165_p3 = pnand %p1163_p2, %p1160_p1 }
 0x18e   :  { %1168 = shalt.err (!%p1165_p3)
}
 0x18f   :  { %829 = dma.vmem_to_hbm [thread:$0]  %s827_s21, 128, %s1288_s3, [#allocation6]  }
 0x190   :  { %1173 = dma.done.wait [#allocation6], 128  }
 0x191   :  { %1174 = vsyncadd [#allocation6], 4294967168 }
 0x192   :  { %833 = vsyncpa [#allocation5], 1 }
 0x193   :  { %834 = vsyncpa [#allocation8], 1 }
 0x194   :  { %835 = vsyncpa [#allocation6], 1 }

</bundles_post_ra>
